<compile_context>
chip_gen: v7x
topology: tpu7x:2x2x1
jax: 0.10.0
libtpu: 0.0.40
codegen_flags: <defaults>
</compile_context>

<pallas_src>
import functools
import math

import jax
import jax.numpy as jnp
from jax.experimental import pallas as pl
from jax.experimental.pallas import tpu as pltpu


# ----------------------------------------------------------------------------
# Kernels
# ----------------------------------------------------------------------------

def _ln_rowwise_kernel(x_ref, w_ref, o_ref, *, eps):
    """General path: one LayerNorm row per tile row (C multiple of 128, or odd C)."""
    x = x_ref[...].astype(jnp.float32)                           # (tm, C)
    mu = jnp.mean(x, axis=-1, keepdims=True)
    ex2 = jnp.mean(x * x, axis=-1, keepdims=True)
    var = jnp.maximum(ex2 - mu * mu, 0.0)                        # unbiased=False
    inv = jax.lax.rsqrt(var + eps)                               # EUP
    # BiasFree: output does NOT subtract the mean.
    y = x * inv * w_ref[...].astype(jnp.float32)
    o_ref[...] = y.astype(o_ref.dtype)


def _ln_folded_kernel(x_ref, seg_ref, segtw_ref, o_ref, *, inv_c, eps):
    """Lane-dense path: G rows folded per (G*C)-lane row (G*C multiple of 128).

    x_ref     : (tm, G*C)  -- G consecutive LayerNorm rows per tile row
    seg_ref   : (G*C, G)   -- 0/1 segment matrix, seg[j, g] = (j // C == g)
    segtw_ref : (G, G*C)   -- back-broadcast matrix with weight folded in,
                              segtw[g, j] = w[j % C] * (j // C == g)
    """
    x = x_ref[...].astype(jnp.float32)                           # (tm, L)
    seg = seg_ref[...]                                           # (L, G) f32
    segtw = segtw_ref[...]                                       # (G, L) f32
    dn = (((1,), (0,)), ((), ()))                                # standard (M,K)@(K,N)

    # Segmented mean / E[x^2] via two small MXU dots (keeps everything
    # lane-dense; no in-kernel reshape/relayout of the (tm, L) tile).
    mu_g = jax.lax.dot_general(x, seg, dn,
                               preferred_element_type=jnp.float32) * inv_c
    ex2_g = jax.lax.dot_general(x * x, seg, dn,
                                preferred_element_type=jnp.float32) * inv_c
    var_g = jnp.maximum(ex2_g - mu_g * mu_g, 0.0)                # (tm, G)
    inv_g = jax.lax.rsqrt(var_g + eps)                           # EUP

    # One back-broadcast dot produces rsqrt(var)*weight for every lane.
    scale = jax.lax.dot_general(inv_g, segtw, dn,
                                preferred_element_type=jnp.float32)  # (tm, L)
    # BiasFree: output does NOT subtract the mean.
    o_ref[...] = (x * scale).astype(o_ref.dtype)


# ----------------------------------------------------------------------------
# Tiling helpers
# ----------------------------------------------------------------------------

def _vmem_budget_bytes():
    """~70% of this generation's physical VMEM (v5e/v6e 128 MiB, v7x 64 MiB)."""
    try:
        cap = int(pltpu.get_tpu_info().vmem_capacity_bytes)
    except Exception:
        cap = 128 << 20
    return int(cap * 0.7)


def _pick_tm(n_rows, lane_width, dtype, budget):
    """Rows per tile: big (amortize ~0.35us/step), dtype-aware sublane multiple,
    VMEM-budgeted, and >=2 grid steps when possible (v7x has 2 TensorCores)."""
    itemsize = jnp.dtype(dtype).itemsize
    sub = max(8, 32 // itemsize)                 # 8 f32, 16 bf16, 32 int8/fp8
    target_tile_bytes = min(8 << 20, budget // 12)
    tm = target_tile_bytes // max(1, lane_width * itemsize)
    tm = max(sub, min(4096, (tm // sub) * sub))
    if tm >= n_rows:
        tm = ((n_rows + sub - 1) // sub) * sub
    # Keep at least 2 grid steps so both v7x TensorCores get work.
    if pl.cdiv(n_rows, tm) < 2 and n_rows > sub:
        half = ((pl.cdiv(n_rows, 2) + sub - 1) // sub) * sub
        if half < n_rows:
            tm = half
    return int(tm)


def _vmem_limit(tm, lane_width, itemsize, extra_bytes, budget):
    io_tile = tm * lane_width * itemsize          # one in/out tile (dbl-buffered)
    f32_tile = tm * lane_width * 4                # in-kernel f32 temporaries
    need = 4 * io_tile + 3 * f32_tile + extra_bytes + (2 << 20)
    return int(max(8 << 20, min(budget, need)))


# ----------------------------------------------------------------------------
# Wrapper
# ----------------------------------------------------------------------------

def biasfree_layernorm(x, weight, *, eps=1e-5):
    """x: (..., C); weight: (C,). Matches BiasFree_LayerNorm.forward."""
    orig_shape = x.shape
    c = int(orig_shape[-1])
    m = 1
    for d in orig_shape[:-1]:
        m *= int(d)
    w2d = jnp.asarray(weight).reshape(1, c)
    dtype = x.dtype
    itemsize = jnp.dtype(dtype).itemsize
    budget = _vmem_budget_bytes()

    # Fold g rows per lane-dense row so the lane width g*c is a multiple of 128.
    g = 128 // math.gcd(c, 128)
    use_folded = (g > 1) and (g <= 16)            # covers C = 32/48/64/96/192/...

    if use_folded:
        lane = g * c
        x2d = x.reshape(m, c)
        m_fold = m
        if m % g != 0:                            # rare: tiny pad (< g rows)
            m_fold = pl.cdiv(m, g) * g
            x2d = jnp.pad(x2d, ((0, m_fold - m), (0, 0)))
        rows = m_fold // g
        xf = x2d.reshape(rows, lane)              # free bitcast when no pad

        tm = _pick_tm(rows, lane, dtype, budget)
        grid = pl.cdiv(rows, tm)

        lane_idx = jnp.arange(lane)
        grp_idx = jnp.arange(g)
        seg = (lane_idx[:, None] // c == grp_idx[None, :]).astype(jnp.float32)
        segtw = ((grp_idx[:, None] == lane_idx[None, :] // c).astype(jnp.float32)
                 * jnp.tile(w2d.astype(jnp.float32), (1, g)))     # (g, lane)
        extra = (seg.size + segtw.size) * 4

        kern = functools.partial(_ln_folded_kernel, inv_c=1.0 / c, eps=eps)
        out = pl.pallas_call(
            kern,
            out_shape=jax.ShapeDtypeStruct((rows, lane), dtype),
            grid=(grid,),
            in_specs=[pl.BlockSpec((tm, lane), lambda i: (i, 0)),
                      pl.BlockSpec((lane, g), lambda i: (0, 0)),
                      pl.BlockSpec((g, lane), lambda i: (0, 0))],
            out_specs=pl.BlockSpec((tm, lane), lambda i: (i, 0)),
            compiler_params=pltpu.CompilerParams(
                dimension_semantics=("parallel",),
                vmem_limit_bytes=_vmem_limit(tm, lane, itemsize, extra, budget)),
        )(xf, seg, segtw)

        out = out.reshape(m_fold, c)
        if m_fold != m:
            out = out[:m]
        return out.reshape(orig_shape)

    # General path (C multiple of 128, or C not a multiple of 8): full-C blocks,
    # ragged last row-block handled by Pallas edge masking (no wrapper pad).
    x2d = x.reshape(m, c)
    tm = _pick_tm(m, c, dtype, budget)
    grid = pl.cdiv(m, tm)
    kern = functools.partial(_ln_rowwise_kernel, eps=eps)
    out = pl.pallas_call(
        kern,
        out_shape=jax.ShapeDtypeStruct((m, c), dtype),
        grid=(grid,),
        in_specs=[pl.BlockSpec((tm, c), lambda i: (i, 0)),
                  pl.BlockSpec((1, c), lambda i: (0, 0))],
        out_specs=pl.BlockSpec((tm, c), lambda i: (i, 0)),
        compiler_params=pltpu.CompilerParams(
            dimension_semantics=("parallel",),
            vmem_limit_bytes=_vmem_limit(tm, c, itemsize, c * 4, budget)),
    )(x2d, w2d)
    return out.reshape(orig_shape)


# ----------------------------------------------------------------------------
# Reference + demo
# ----------------------------------------------------------------------------

def _reference(x, w, eps=1e-5):
    xf = x.astype(jnp.float32)
    var = jnp.var(xf, axis=-1, keepdims=True)                     # unbiased=False
    return (xf / jnp.sqrt(var + eps) * w.astype(jnp.float32)).astype(x.dtype)


if __name__ == "__main__":
    key = jax.random.PRNGKey(0)
    k1, k2, k3, k4 = jax.random.split(key, 4)

    fwd = jax.jit(biasfree_layernorm)

    # Case 1: Restormer-style C=48 -> lane-dense folded path (g=8, lane=384).
    x1 = jax.random.normal(k1, (2, 16, 16, 48), jnp.float32)
    w1 = 1.0 + 0.05 * jax.random.normal(k2, (48,), jnp.float32)

    # Case 2: folded path with m % g != 0 (exercises the tiny pad branch).
    x2 = jax.random.normal(k3, (3, 7, 5, 48), jnp.float32)

    # Case 3: C=256 with ragged row count -> row-wise path, masked last block.
    x3 = jax.random.normal(k4, (2, 97, 256), jnp.float32)
    w3 = jnp.ones((256,), jnp.float32)                            # PyTorch init: ones

    y1 = jax.block_until_ready(fwd(x1, w1))
    y2 = jax.block_until_ready(fwd(x2, w1))
    y3 = jax.block_until_ready(fwd(x3, w3))

    for y, x, w in ((y1, x1, w1), (y2, x2, w1), (y3, x3, w3)):
        assert y.shape == x.shape
        assert jnp.all(jnp.isfinite(y))
        assert jnp.allclose(y, _reference(x, w), rtol=2e-5, atol=2e-5)
    print("KERNEL_OK")
</pallas_src>

<mosaic_0001>
module attributes {stable_mosaic.version = 11 : i64} {
  func.func @_ln_folded_kernel(%arg0: i32, %arg1: memref<32x384xf32, #tpu.memory_space<vmem>>, %arg2: memref<384x8xf32, #tpu.memory_space<vmem>>, %arg3: memref<8x384xf32, #tpu.memory_space<vmem>>, %arg4: memref<32x384xf32, #tpu.memory_space<vmem>>) attributes {dimension_semantics = [#tpu.dimension_semantics<parallel>], iteration_bounds = array<i64: 2>, scalar_prefetch = 0 : i64, scratch_operands = 0 : i64, tpu.core_type = #tpu.core_type<tc>, window_params = [{transform_indices = @transform_0, window_bounds = array<i64: 32, 384>}, {pipeline_mode = #tpu.pipeline_mode<synchronous>, transform_indices = @transform_1, window_bounds = array<i64: 384, 8>}, {pipeline_mode = #tpu.pipeline_mode<synchronous>, transform_indices = @transform_2, window_bounds = array<i64: 8, 384>}, {transform_indices = @transform_3, window_bounds = array<i64: 32, 384>}]} {
    %c0 = arith.constant 0 : index
    %c0_0 = arith.constant 0 : index
    %0 = vector.load %arg1[%c0, %c0_0] : memref<32x384xf32, #tpu.memory_space<vmem>>, vector<32x384xf32>
    %c0_1 = arith.constant 0 : index
    %c0_2 = arith.constant 0 : index
    %1 = vector.load %arg2[%c0_1, %c0_2] : memref<384x8xf32, #tpu.memory_space<vmem>>, vector<384x8xf32>
    %c0_3 = arith.constant 0 : index
    %c0_4 = arith.constant 0 : index
    %2 = vector.load %arg3[%c0_3, %c0_4] : memref<8x384xf32, #tpu.memory_space<vmem>>, vector<8x384xf32>
    %cst = arith.constant dense<0.000000e+00> : vector<32x8xf32>
    %3 = tpu.matmul %0, %1, %cst {dimension_numbers = #tpu.dot_dimension_numbers<[1], [0], [0], [1], [0, 0, 1, 1], [], []>} : vector<32x384xf32>, vector<384x8xf32>, vector<32x8xf32> -> vector<32x8xf32>
    %cst_5 = arith.constant 0.020833334 : f32
    %4 = vector.broadcast %cst_5 : f32 to vector<32x8xf32>
    %5 = arith.mulf %3, %4 : vector<32x8xf32>
    %6 = arith.mulf %0, %0 : vector<32x384xf32>
    %cst_6 = arith.constant dense<0.000000e+00> : vector<32x8xf32>
    %7 = tpu.matmul %6, %1, %cst_6 {dimension_numbers = #tpu.dot_dimension_numbers<[1], [0], [0], [1], [0, 0, 1, 1], [], []>} : vector<32x384xf32>, vector<384x8xf32>, vector<32x8xf32> -> vector<32x8xf32>
    %cst_7 = arith.constant 0.020833334 : f32
    %8 = vector.broadcast %cst_7 : f32 to vector<32x8xf32>
    %9 = arith.mulf %7, %8 : vector<32x8xf32>
    %10 = arith.mulf %5, %5 : vector<32x8xf32>
    %11 = arith.subf %9, %10 : vector<32x8xf32>
    %cst_8 = arith.constant 0.000000e+00 : f32
    %12 = vector.broadcast %cst_8 : f32 to vector<32x8xf32>
    %13 = arith.maximumf %11, %12 : vector<32x8xf32>
    %cst_9 = arith.constant 9.99999974E-6 : f32
    %14 = vector.broadcast %cst_9 : f32 to vector<32x8xf32>
    %15 = arith.addf %13, %14 : vector<32x8xf32>
    %16 = math.rsqrt %15 : vector<32x8xf32>
    %cst_10 = arith.constant dense<0.000000e+00> : vector<32x384xf32>
    %17 = tpu.matmul %16, %2, %cst_10 {dimension_numbers = #tpu.dot_dimension_numbers<[1], [0], [0], [1], [0, 0, 1, 1], [], []>} : vector<32x8xf32>, vector<8x384xf32>, vector<32x384xf32> -> vector<32x384xf32>
    %18 = arith.mulf %0, %17 : vector<32x384xf32>
    %c0_11 = arith.constant 0 : index
    %c0_12 = arith.constant 0 : index
    %19 = vector.load %arg4[%c0_11, %c0_12] : memref<32x384xf32, #tpu.memory_space<vmem>>, vector<32x384xf32>
    tpu.vector_store %arg4[%c0_11, %c0_12], %18 {strides = array<i32>} : memref<32x384xf32, #tpu.memory_space<vmem>>, vector<32x384xf32>,
    return
  }
  func.func @transform_0(%arg0: i32) -> (i32, i32) {
    %c0_i32 = arith.constant 0 : i32
    %c0_i32_0 = arith.constant 0 : i32
    return %arg0, %c0_i32 : i32, i32
  }
  func.func @transform_1(%arg0: i32) -> (i32, i32) {
    %c0_i32 = arith.constant 0 : i32
    %c0_i32_0 = arith.constant 0 : i32
    %c0_i32_1 = arith.constant 0 : i32
    return %c0_i32, %c0_i32_0 : i32, i32
  }
  func.func @transform_2(%arg0: i32) -> (i32, i32) {
    %c0_i32 = arith.constant 0 : i32
    %c0_i32_0 = arith.constant 0 : i32
    %c0_i32_1 = arith.constant 0 : i32
    return %c0_i32, %c0_i32_0 : i32, i32
  }
  func.func @transform_3(%arg0: i32) -> (i32, i32) {
    %c0_i32 = arith.constant 0 : i32
    %c0_i32_0 = arith.constant 0 : i32
    return %arg0, %c0_i32 : i32, i32
  }
}

</mosaic_0001>

<bundles_post_ra>
// kernel: biasfree_layernorm.1
= control target key start
LH: loop header
LB: loop body
LE: loop exit
PB: predicated region body
PF: predicated region fallthrough
CT: control target
= control target key end

     0   :  { %s1302_s12 = smov 0   ;;  %s1700_s0 = inlined_call_operand.vmem [shape: f32[64,384], index: 0, kind: input, shape index: {}]   ;;  %s1701_s1 = inlined_call_operand.vmem [shape: f32[384,8], index: 1, kind: input, shape index: {}]   ;;  %s1702_s2 = inlined_call_operand.vmem [shape: f32[8,384], index: 2, kind: input, shape index: {}]   ;;  %s1703_s3 = inlined_call_operand.vmem [shape: f32[64,384], index: 3, kind: output, shape index: {}]  }
   0x1 LB: > { %s891_s13 = sadd.s32 4294967295, %s1279_s12   ;;  %p895_p0 = scmp.ge.s32.totalorder %s1279_s12, 1  ;;  %s1279_s12 = sphi %s1302_s12, %s13_s12  }
   0x2   : > { %p139_p1 = scmp.lt.s32.totalorder %s1279_s12, 3 }
   0x4   : > { %p140_p2 = pnand %p895_p0, %p139_p1 }
   0x5   : > { %v207_v0 = vld [vmem:[%s1701_s1 + $0x80] sm:$0xff] (!%p140_p2)  ;;  %v208_v1 = vld [vmem:[%s1701_s1 + $0x88] sm:$0xff] (!%p140_p2)  ;;  %s896_s20 = sshll.u32 (!%p140_p2), %s891_s13, 2  ;;  %v209_v9 = vld [vmem:[%s1701_s1 + $0x90] sm:$0xff] (!%p140_p2)  ;;  %vm622_vm0 = vcmask (!%p140_p2), 64512  }
   0x6   : > { %143 = sbr.rel (%p140_p2) target bundleno = 536 (0x218), region = 32  ;;  %v191_v2 = vld [vmem:[%s1701_s1] sm:$0xff] (!%p140_p2)  ;;  %v1319_v3 = vpack.c.bf16 (!%p140_p2), %v208_v1, %v207_v0  ;;  %v192_v4 = vld [vmem:[%s1701_s1 + $0x8] sm:$0xff] (!%p140_p2)  ;;  %p166_p3 = scmp.lt.s32.totalorder (!%p140_p2), %s896_s20, 7  ;;  %v210_v10 = vld [vmem:[%s1701_s1 + $0x98] sm:$0xff] (!%p140_p2) }
   0x7   : > { %v223_v5 = vld [vmem:[%s1701_s1 + $0x100] sm:$0xff] (!%p140_p2)  ;;  %v224_v6 = vld [vmem:[%s1701_s1 + $0x108] sm:$0xff] (!%p140_p2)  ;;  %v1330_v7 = vpack.c.bf16 (!%p140_p2), %v192_v4, %v191_v2  ;;  %v193_v11 = vld [vmem:[%s1701_s1 + $0x10] sm:$0xff] (!%p140_p2)  ;;  %v1344_v12 = vpack.c.bf16 (!%p140_p2), %v210_v10, %v209_v9 }
   0x8   : > { %v1332_v8 = vpack.c.bf16 (!%p140_p2), %v224_v6, %v223_v5  ;;  %1128 = vmatprep.subr.bf16.mxu0 (!%p140_p2), %v1319_v3  ;;  %v194_v13 = vld [vmem:[%s1701_s1 + $0x18] sm:$0xff] (!%p140_p2)  ;;  %v225_v14 = vld [vmem:[%s1701_s1 + $0x110] sm:$0xff] (!%p140_p2)  ;;  %v211_v18 = vld [vmem:[%s1701_s1 + $0xa0] sm:$0xff] (!%p140_p2) }
   0x9   : > { %v226_v15 = vld [vmem:[%s1701_s1 + $0x118] sm:$0xff] (!%p140_p2)  ;;  %1130 = vmatpush3.bf16.msra.mxu0 (!%p140_p2), %v1330_v7  ;;  %v1357_v16 = vpack.c.bf16 (!%p140_p2), %v194_v13, %v193_v11  ;;  %v212_v19 = vld [vmem:[%s1701_s1 + $0xa8] sm:$0xff] (!%p140_p2)  ;;  %v195_v20 = vld [vmem:[%s1701_s1 + $0x20] sm:$0xff] (!%p140_p2) }
   0xa   : > { %1160 = vmatprep.subr.bf16.mxu1 (!%p140_p2), %v1332_v8  ;;  %v1359_v17 = vpack.c.bf16 (!%p140_p2), %v226_v15, %v225_v14  ;;  %1132 = vmatprep.subr.bf16.mxu0 (!%p140_p2), %v1344_v12  ;;  %v1372_v21 = vpack.c.bf16 (!%p140_p2), %v212_v19, %v211_v18  ;;  %v196_v22 = vld [vmem:[%s1701_s1 + $0x28] sm:$0xff] (!%p140_p2)  ;;  %v227_v23 = vld [vmem:[%s1701_s1 + $0x120] sm:$0xff] (!%p140_p2)  ;;  %v213_v26 = vld [vmem:[%s1701_s1 + $0xb0] sm:$0xff] (!%p140_p2) }
   0xb   : > { %1162 = vmatpush3.bf16.msra.mxu1 (!%p140_p2), %v1332_v8  ;;  %v228_v24 = vld [vmem:[%s1701_s1 + $0x128] sm:$0xff] (!%p140_p2)  ;;  %v214_v27 = vld [vmem:[%s1701_s1 + $0xb8] sm:$0xff] (!%p140_p2)  ;;  %v229_v28 = vld [vmem:[%s1701_s1 + $0x130] sm:$0xff] (!%p140_p2)  ;;  %v1402_v30 = vpack.c.bf16 (!%p140_p2), %v196_v22, %v195_v20 }
   0xc   : > { %1164 = vmatprep.subr.bf16.mxu1 (!%p140_p2), %v1359_v17  ;;  %v1387_v25 = vpack.c.bf16 (!%p140_p2), %v228_v24, %v227_v23  ;;  %v230_v29 = vld [vmem:[%s1701_s1 + $0x138] sm:$0xff] (!%p140_p2)  ;;  %v1406_v31 = vpack.c.bf16 (!%p140_p2), %v214_v27, %v213_v26  ;;  %v197_v32 = vld [vmem:[%s1701_s1 + $0x30] sm:$0xff] (!%p140_p2)  ;;  %v215_v35 = vld [vmem:[%s1701_s1 + $0xc0] sm:$0xff] (!%p140_p2) }
   0xd   : > { %s1705_s20 = smov (!%p166_p3, %s896_s20), 7  ;;  %1134 = vmatpush3.bf16.msra.mxu0 %v1357_v16  ;;  %v198_v33 = vld [vmem:[%s1701_s1 + $0x38] sm:$0xff]  ;;  %v1416_v34 = vpack.c.bf16 %v230_v29, %v229_v28  ;;  %v216_v36 = vld [vmem:[%s1701_s1 + $0xc8] sm:$0xff]  ;;  %v231_v37 = vld [vmem:[%s1701_s1 + $0x140] sm:$0xff] }
   0xe   : > { %1136 = vmatprep.subr.bf16.mxu0 %v1372_v21  ;;  %s1255_s11 = smul.u32 24, %s1705_s20  ;;  %v232_v38 = vld [vmem:[%s1701_s1 + $0x148] sm:$0xff]  ;;  %v1431_v39 = vpack.c.bf16 %v198_v33, %v197_v32  ;;  %v1435_v40 = vpack.c.bf16 %v216_v36, %v215_v35  ;;  %v199_v41 = vld [vmem:[%s1701_s1 + $0x40] sm:$0xff]  ;;  %v217_v44 = vld [vmem:[%s1701_s1 + $0xd0] sm:$0xff] }
   0xf   : > { %1166 = vmatpush3.bf16.msra.mxu1 %v1359_v17  ;;  %v200_v42 = vld [vmem:[%s1701_s1 + $0x48] sm:$0xff]  ;;  %v1451_v43 = vpack.c.bf16 %v232_v38, %v231_v37  ;;  %v218_v45 = vld [vmem:[%s1701_s1 + $0xd8] sm:$0xff]  ;;  %v233_v46 = vld [vmem:[%s1701_s1 + $0x150] sm:$0xff] }
  0x10   : > { %1168 = vmatprep.subr.bf16.mxu1 %v1387_v25  ;;  %s1448_s28 = scalar_lea.vmem %s1700_s0, %s1255_s11  ;;  %v234_v47 = vld [vmem:[%s1701_s1 + $0x158] sm:$0xff]  ;;  %v1466_v48 = vpack.c.bf16 %v200_v42, %v199_v41  ;;  %v1476_v51 = vpack.c.bf16 %v218_v45, %v217_v44  ;;  %v201_v52 = vld [vmem:[%s1701_s1 + $0x50] sm:$0xff]  ;;  %v219_v55 = vld [vmem:[%s1701_s1 + $0xe0] sm:$0xff]  ;;  %s1671_s25 = scalar_lea.vmem %s1703_s3, %s1255_s11 }
  0x11   : > { %1138 = vmatpush3.bf16.msra.mxu0 %v1402_v30  ;;  %v1469_v49 = vld [vmem:[%s1448_s28 + $0x8] sm:$0xff]  ;;  %v1472_v50 = vld [vmem:[%s1448_s28 + $0x10] sm:$0xff]  ;;  %v202_v53 = vld [vmem:[%s1701_s1 + $0x58] sm:$0xff]  ;;  %v1485_v54 = vpack.c.bf16 %v234_v47, %v233_v46 }
  0x12   : > { %1140 = vmatprep.subr.bf16.mxu0 %v1406_v31  ;;  %v220_v56 = vld [vmem:[%s1701_s1 + $0xe8] sm:$0xff]  ;;  %306 = vmatprep.mubr.f32.mxu0 %v1469_v49  ;;  %v235_v57 = vld [vmem:[%s1701_s1 + $0x160] sm:$0xff]  ;;  %v1502_v59 = vpack.c.bf16 %v202_v53, %v201_v52  ;;  %v221_v0 = vld [vmem:[%s1701_s1 + $0xf0] sm:$0xff]  ;;  %v418_v22 = vmul.f32 %v1472_v50, %v1472_v50 }
  0x13   : > { %1170 = vmatpush3.bf16.msra.mxu1 %v1387_v25  ;;  %v236_v58 = vld [vmem:[%s1701_s1 + $0x168] sm:$0xff]  ;;  %1075 = vmatprep.mubr.f32.mxu1 %v1472_v50  ;;  %v1506_v60 = vpack.c.bf16 %v220_v56, %v219_v55  ;;  %v203_v61 = vld [vmem:[%s1701_s1 + $0x60] sm:$0xff]  ;;  %v222_v1 = vld [vmem:[%s1701_s1 + $0xf8] sm:$0xff] }
  0x14   : > { %1172 = vmatprep.subr.bf16.mxu1 %v1416_v34  ;;  %v204_v62 = vld [vmem:[%s1701_s1 + $0x68] sm:$0xff]  ;;  %v1515_v63 = vpack.c.bf16 %v236_v58, %v235_v57  ;;  %v237_v2 = vld [vmem:[%s1701_s1 + $0x170] sm:$0xff]  ;;  %v238_v4 = vld [vmem:[%s1701_s1 + $0x178] sm:$0xff]  ;;  %v1534_v6 = vpack.c.bf16 %v222_v1, %v221_v0 }
  0x15   : > { %1142 = vmatpush3.bf16.msra.mxu0 %v1431_v39  ;;  %v1530_v5 = vpack.c.bf16 %v204_v62, %v203_v61  ;;  %v205_v9 = vld [vmem:[%s1701_s1 + $0x70] sm:$0xff]  ;;  %v206_v10 = vld [vmem:[%s1701_s1 + $0x78] sm:$0xff]  ;;  %v1543_v11 = vpack.c.bf16 %v238_v4, %v237_v2  ;;  %v1550_v14 = vld [vmem:[%s1448_s28] sm:$0xff] }
  0x16   : > { %1144 = vmatprep.subr.bf16.mxu0 %v1435_v40  ;;  %v1157_v13 = vpack.c.bf16 %v206_v10, %v205_v9  ;;  %v1555_v15 = vld [vmem:[%s1448_s28 + $0x28] sm:$0xff]  ;;  %v1559_v18 = vld [vmem:[%s1448_s28 + $0x20] sm:$0xff]  ;;  %v1565_v19 = vld [vmem:[%s1448_s28 + $0x18] sm:$0xff] }
  0x17   : > { %1174 = vmatpush3.bf16.msra.mxu1 %v1416_v34  ;;  %v1568_v20 = vld [vmem:[%s1448_s28 + $0x40] sm:$0xff]  ;;  %v421_v23 = vmul.f32 %v1555_v15, %v1555_v15  ;;  %v420_v24 = vmul.f32 %v1559_v18, %v1559_v18  ;;  %v419_v26 = vmul.f32 %v1565_v19, %v1565_v19  ;;  %v240_v32 = vld [vmem:[%s1702_s2 + $0x8] sm:$0xff]  ;;  %v241_v35 = vld [vmem:[%s1702_s2 + $0x10] sm:$0xff] }
  0x18   : > { %1176 = vmatprep.subr.bf16.mxu1 %v1451_v43  ;;  %v239_v33 = vld [vmem:[%s1702_s2] sm:$0xff] }
  0x19   : > { %1146 = vmatpush3.bf16.msra.mxu0 %v1466_v48 }
  0x1a   : > { %1148 = vmatprep.subr.bf16.mxu0 %v1476_v51 }
  0x1b   : > { %1178 = vmatpush3.bf16.msra.mxu1 %v1451_v43 }
  0x1c   : > { %1180 = vmatprep.subr.bf16.mxu1 %v1485_v54 }
  0x1d   : > { %1150 = vmatpush3.bf16.msra.mxu0 %v1502_v59 }
  0x1e   : > { %1152 = vmatprep.subr.bf16.mxu0 %v1506_v60 }
  0x1f   : > { %1182 = vmatpush3.bf16.msra.mxu1 %v1485_v54 }
  0x20   : > { %1184 = vmatprep.subr.bf16.mxu1 %v1515_v63 }
  0x21   : > { %1154 = vmatpush3.bf16.msra.mxu0 %v1530_v5 }
  0x22   : > { %1156 = vmatprep.subr.bf16.mxu0 %v1534_v6 }
  0x23   : > { %1186 = vmatpush3.bf16.msra.mxu1 %v1515_v63 }
  0x24   : > { %1188 = vmatprep.subr.bf16.mxu1 %v1543_v11 }
  0x25   : > { %1158 = vmatpush3.bf16.msra.mxu0 %v1157_v13 }
  0x26   : > { %1192 = vmatprep.subr.bf16.mxu0 %v1319_v3  ;;  %v1573_v3 = vld [vmem:[%s1448_s28 + $0x38] sm:$0xff] }
  0x27   : > { %1190 = vmatpush3.bf16.msra.mxu1 %v1543_v11  ;;  %v423_v27 = vmul.f32 %v1573_v3, %v1573_v3 }
  0x28   : > { %1224 = vmatprep.subr.bf16.mxu1 %v1332_v8  ;;  %307 = vmatmul.mubr.f32.vlgmr.msra.gmra.mrb[0].mxu0 %v1550_v14 }
  0x29   : > { %1194 = vmatpush3.bf16.msra.mxu0 %v1330_v7  ;;  %311 = vmatprep.mubr.f32.mxu0 %v1559_v18  ;;  %v1580_v7 = vld [vmem:[%s1448_s28 + $0x58] sm:$0xff] }
  0x2a   : > { %1076 = vmatmul.mubr.f32.vlgmr.msra.gmra.mrb[0].mxu1 %v1555_v15  ;;  %1196 = vmatprep.subr.bf16.mxu0 %v1344_v12  ;;  %v1592_v12 = vld [vmem:[%s1448_s28 + $0x50] sm:$0xff]  ;;  %v427_v28 = vmul.f32 %v1580_v7, %v1580_v7 }
  0x2b   : > { %1226 = vmatpush3.bf16.msra.mxu1 %v1332_v8  ;;  %1078 = vmatprep.mubr.f32.mxu1 %v1568_v20  ;;  %v1587_v8 = vld [vmem:[%s1448_s28 + $0x30] sm:$0xff] }
  0x2c   : > { %1228 = vmatprep.subr.bf16.mxu1 %v1359_v17  ;;  %312 = vmatmul.mubr.f32.gmra.mrb[2].mxu0 %v1565_v19  ;;  %v422_v29 = vmul.f32 %v1587_v8, %v1587_v8 }
  0x2d   : > { %1198 = vmatpush3.bf16.msra.mxu0 %v1357_v16  ;;  %316 = vmatprep.mubr.f32.mxu0 %v1573_v3  ;;  %v1600_v16 = vld [vmem:[%s1448_s28 + $0x48] sm:$0xff] }
  0x2e   : > { %1200 = vmatprep.subr.bf16.mxu0 %v1372_v21  ;;  %1079 = vmatmul.mubr.f32.gmra.mrb[2].mxu1 %v1580_v7  ;;  %v416_v21 = vmul.f32 %v1550_v14, %v1550_v14 }
  0x2f   : > { %1230 = vmatpush3.bf16.msra.mxu1 %v1359_v17  ;;  %1113 = vmatprep.mubr.f32.mxu1 %v418_v22  ;;  %v417_v17 = vmul.f32 %v1469_v49, %v1469_v49 }
  0x30   : > { %1232 = vmatprep.subr.bf16.mxu1 %v1387_v25  ;;  %317 = vmatmul.mubr.f32.gmra.mrb[4].mxu0 %v1587_v8 }
  0x31   : > { %1202 = vmatpush3.bf16.msra.mxu0 %v1402_v30  ;;  %321 = vmatprep.mubr.f32.mxu0 %v1592_v12  ;;  %v426_v30 = vmul.f32 %v1592_v12, %v1592_v12 }
  0x32   : > { %1204 = vmatprep.subr.bf16.mxu0 %v1406_v31  ;;  %v425_v31 = vmul.f32 %v1600_v16, %v1600_v16 }
  0x33   : > { %1234 = vmatpush3.bf16.msra.mxu1 %v1387_v25  ;;  %v424_v25 = vmul.f32 %v1568_v20, %v1568_v20 }
  0x34   : > { %1236 = vmatprep.subr.bf16.mxu1 %v1416_v34  ;;  %322 = vmatmul.mubr.f32.gmra.mrb[6].mxu0 %v1600_v16 }
  0x35   : > { %1206 = vmatpush3.bf16.msra.mxu0 %v1431_v39  ;;  %492 = vmatprep.mubr.f32.mxu0 %v417_v17 }
  0x36   : > { %1208 = vmatprep.subr.bf16.mxu0 %v1435_v40 }
  0x37   : > { %1238 = vmatpush3.bf16.msra.mxu1 %v1416_v34  ;;  %v1281_v34 = vmov 0.0  }
  0x38   : > { %1240 = vmatprep.subr.bf16.mxu1 %v1451_v43 }
  0x39   : > { %1210 = vmatpush3.bf16.msra.mxu0 %v1466_v48 }
  0x3a   : > { %1212 = vmatprep.subr.bf16.mxu0 %v1476_v51 }
  0x3b   : > { %1242 = vmatpush3.bf16.msra.mxu1 %v1451_v43 }
  0x3c   : > { %1244 = vmatprep.subr.bf16.mxu1 %v1485_v54 }
  0x3d   : > { %1214 = vmatpush3.bf16.msra.mxu0 %v1502_v59 }
  0x3e   : > { %1216 = vmatprep.subr.bf16.mxu0 %v1506_v60 }
  0x3f   : > { %1246 = vmatpush3.bf16.msra.mxu1 %v1485_v54 }
  0x40   : > { %1248 = vmatprep.subr.bf16.mxu1 %v1515_v63 }
  0x41   : > { %1218 = vmatpush3.bf16.msra.mxu0 %v1530_v5 }
  0x42   : > { %1220 = vmatprep.subr.bf16.mxu0 %v1534_v6 }
  0x43   : > { %1250 = vmatpush3.bf16.msra.mxu1 %v1515_v63 }
  0x44   : > { %1252 = vmatprep.subr.bf16.mxu1 %v1543_v11 }
  0x45   : > { %1222 = vmatpush3.bf16.msra.mxu0 %v1157_v13 }
  0x46   : > { %1119 = vmatprep.subr.mxu0 %v241_v35 }
  0x47   : > { %1254 = vmatpush3.bf16.msra.mxu1 %v1543_v11 }
  0x48   : > { %493 = vmatmul.mubr.f32.vlgmr.msra.gmra.mrb[8].mxu0 %v416_v21  ;;  %635 = vmatprep.subr.mxu1 %v240_v32 }
  0x49   : > { %497 = vmatprep.mubr.f32.mxu0 %v420_v24  ;;  %1120 = vmatpush3.msra.mxu0 %v241_v35 }
  0x4a   : > { %1114 = vmatmul.mubr.f32.vlgmr.msra.gmra.mrb[4].mxu1 %v421_v23 }
  0x4b   : > { %1116 = vmatprep.mubr.f32.mxu1 %v424_v25  ;;  %636 = vmatpush1.msra.mxu1 %v239_v33 }
  0x4c   : > { %498 = vmatmul.mubr.f32.gmra.mrb[10].mxu0 %v419_v26 }
  0x4d   : > { %502 = vmatprep.mubr.f32.mxu0 %v423_v27 }
  0x4e   : > { %1117 = vmatmul.mubr.f32.gmra.mrb[6].mxu1 %v427_v28 }
  0x4f   : > { %699 = vmatprep.mubr.f32.mxu1 %v1281_v34 }
  0x50   : > { %503 = vmatmul.mubr.f32.gmra.mrb[12].mxu0 %v422_v29 }
  0x51   : > { %507 = vmatprep.mubr.f32.mxu0 %v426_v30 }
  0x54   : > { %508 = vmatmul.mubr.f32.gmra.mrb[14].mxu0 %v425_v31 }
  0xfb   : > { %v942_v36 = vpop.f32.mrb[0].mxu0 }
  0xfc   : > { %v943_v37 = vpop.f32.mrb[1].mxu0 }
  0xfd   : > { %v1077_v38 = vpop.f32.mrb[0].mxu1  ;;  %v944_v39 = vadd.f32 %v943_v37, %v942_v36 }
  0xfe   : > { %v393_v40 = vpop.f32.mrb[1].mxu1 }
  0xff   : > { %v394_v41 = vadd.f32 %v944_v39, %v393_v40  ;;  %v945_v42 = vpop.f32.mrb[2].mxu0 }
 0x100   : > { %v946_v43 = vpop.f32.mrb[3].mxu0 }
 0x101   : > { %v947_v44 = vadd.f32 %v946_v43, %v945_v42  ;;  %v1080_v45 = vpop.f32.mrb[2].mxu1  ;;  %v412_v61 = vmul.f32 0.020833334, %v394_v41 }
 0x102   : > { %v403_v48 = vpop.f32.mrb[3].mxu1 }
 0x103   : > { %v399_v46 = vadd.f32 %v1077_v38, %v947_v44  ;;  %v948_v47 = vpop.f32.mrb[4].mxu0  ;;  %v602_v5 = vmul.f32 %v412_v61, %v412_v61 }
 0x104   : > { %v949_v51 = vpop.f32.mrb[5].mxu0 }
 0x105   : > { %v950_v52 = vadd.f32 %v949_v51, %v948_v47  ;;  %v413_v6 = vmul.f32 0.020833334, %v399_v46 }
 0x107   : > { %v404_v53 = vadd.f32 %v950_v52, %v403_v48  ;;  %v951_v54 = vpop.f32.mrb[6].mxu0  ;;  %v603_v24 = vmul.f32 %v413_v6, %v413_v6 }
 0x108   : > { %v952_v55 = vpop.f32.mrb[7].mxu0 }
 0x109   : > { %v953_v56 = vadd.f32 %v952_v55, %v951_v54  ;;  %v414_v21 = vmul.f32 0.020833334, %v404_v53 }
 0x10b   : > { %v409_v57 = vadd.f32 %v1080_v45, %v953_v56  ;;  %v604_v32 = vmul.f32 %v414_v21, %v414_v21 }
 0x10d   : > { %v415_v33 = vmul.f32 0.020833334, %v409_v57 }
 0x10f   : > { %v605_v42 = vmul.f32 %v415_v33, %v415_v33 }
 0x11b   : > { %v1006_v58 = vpop.f32.mrb[8].mxu0 }
 0x11c   : > { %v1007_v59 = vpop.f32.mrb[9].mxu0 }
 0x11d   : > { %v1115_v60 = vpop.f32.mrb[4].mxu1  ;;  %v1008_v62 = vadd.f32 %v1007_v59, %v1006_v58 }
 0x11e   : > { %v579_v63 = vpop.f32.mrb[5].mxu1 }
 0x11f   : > { %v580_v0 = vadd.f32 %v1008_v62, %v579_v63  ;;  %v1009_v1 = vpop.f32.mrb[10].mxu0 }
 0x120   : > { %v1010_v2 = vpop.f32.mrb[11].mxu0 }
 0x121   : > { %v1118_v4 = vpop.f32.mrb[6].mxu1  ;;  %v598_v9 = vmul.f32 0.020833334, %v580_v0  ;;  %v1011_v10 = vadd.f32 %v1010_v2, %v1009_v1 }
 0x122   : > { %v589_v11 = vpop.f32.mrb[7].mxu1 }
 0x123   : > { %v606_v13 = vsub.f32 %v598_v9, %v602_v5  ;;  %v585_v22 = vadd.f32 %v1115_v60, %v1011_v10  ;;  %v1012_v17 = vpop.f32.mrb[12].mxu0 }
 0x124   : > { %v1013_v23 = vpop.f32.mrb[13].mxu0 }
 0x125   : > { %v610_v25 = vmax.f32 %v606_v13, 0.0  ;;  %v599_v26 = vmul.f32 0.020833334, %v585_v22  ;;  %v1014_v27 = vadd.f32 %v1013_v23, %v1012_v17 }
 0x127   : > { %v614_v28 = vadd.f32 1e-05, %v610_v25  ;;  %v607_v29 = vsub.f32 %v599_v26, %v603_v24  ;;  %v590_v30 = vadd.f32 %v1014_v27, %v589_v11  ;;  %v1015_v31 = vpop.f32.mrb[14].mxu0 }
 0x128   : > { %v1016_v35 = vpop.f32.mrb[15].mxu0 }
 0x129   : > { %1265 = vrsqrt.f32 %v614_v28  ;;  %v611_v36 = vmax.f32 %v607_v29, 0.0  ;;  %v600_v37 = vmul.f32 0.020833334, %v590_v30  ;;  %v1017_v38 = vadd.f32 %v1016_v35, %v1015_v31 }
 0x12b   : > { %v615_v39 = vadd.f32 1e-05, %v611_v36  ;;  %v608_v40 = vsub.f32 %v600_v37, %v604_v32  ;;  %v595_v41 = vadd.f32 %v1118_v4, %v1017_v38 }
 0x12d   : > { %1267 = vrsqrt.f32 %v615_v39  ;;  %v612_v43 = vmax.f32 %v608_v40, 0.0  ;;  %v601_v44 = vmul.f32 0.020833334, %v595_v41 }
 0x12f   : > { %v616_v45 = vadd.f32 1e-05, %v612_v43  ;;  %v609_v46 = vsub.f32 %v601_v44, %v605_v42 }
 0x131   : > { %1269 = vrsqrt.f32 %v616_v45  ;;  %v613_v47 = vmax.f32 %v609_v46, 0.0 }
 0x133   : > { %v1266_v48 = vpop.eup %1265  ;;  %v617_v51 = vadd.f32 1e-05, %v613_v47 }
 0x134   : > { %900 = vmatmul.mubr.msk.f32.vlgmr.msra.gmra.mrb[8].mxu1 %vm622_vm0, %v1266_v48  ;;  %1121 = vmatprep.mubr.msk.f32.mxu0 %vm622_vm0, %v1266_v48 }
 0x135   : > { %1271 = vrsqrt.f32 %v617_v51  ;;  %705 = vmatprep.mubr.f32.mxu1 %v1281_v34 }
 0x137   : > { %v1268_v52 = vpop.eup %1267 }
 0x138   : > { %901 = vmatmul.mubr.msk.f32.gmra.mrb[10].mxu1 %vm622_vm0, %v1268_v52  ;;  %1122 = vmatmul.mubr.msk.f32.vlgmr.msra.gmra.mrb[16].mxu0 %vm622_vm0, %v1268_v52 }
 0x139   : > { %711 = vmatprep.mubr.f32.mxu1 %v1281_v34 }
 0x13b   : > { %v1270_v53 = vpop.eup %1269 }
 0x13c   : > { %902 = vmatmul.mubr.msk.f32.gmra.mrb[12].mxu1 %vm622_vm0, %v1270_v53  ;;  %1124 = vmatprep.mubr.msk.f32.mxu0 %vm622_vm0, %v1270_v53 }
 0x13d   : > { %717 = vmatprep.mubr.f32.mxu1 %v1281_v34 }
 0x13f   : > { %v1272_v54 = vpop.eup %1271 }
 0x140   : > { %903 = vmatmul.mubr.msk.f32.gmra.mrb[14].mxu1 %vm622_vm0, %v1272_v54  ;;  %1125 = vmatmul.mubr.msk.f32.gmra.mrb[18].mxu0 %vm622_vm0, %v1272_v54 }
 0x207   : > { %v701_v55 = vpop.f32.mrb[8].mxu1 }
 0x208   : > { %v809_v56 = vmul.f32 %v701_v55, %v1550_v14  ;;  %v703_v34 = vpop.f32.mrb[9].mxu1 }
 0x209   : > { %v810_v57 = vmul.f32 %v703_v34, %v1469_v49 }
 0x20a   : > { %821 = vst [vmem:[%s1671_s25] sm:$0xff] %v809_v56 }
 0x20b   : > { %822 = vst [vmem:[%s1671_s25 + $0x8] sm:$0xff] %v810_v57  ;;  %v707_v58 = vpop.f32.mrb[10].mxu1  ;;  %v1123_v59 = vpop.f32.mrb[16].mxu0 }
 0x20c   : > { %v812_v60 = vmul.f32 %v707_v58, %v1565_v19  ;;  %v709_v61 = vpop.f32.mrb[11].mxu1  ;;  %v790_v62 = vpop.f32.mrb[17].mxu0  ;;  %v814_v14 = vmul.f32 %v1123_v59, %v1555_v15 }
 0x20d   : > { %v813_v63 = vmul.f32 %v709_v61, %v1559_v18  ;;  %v811_v0 = vmul.f32 %v790_v62, %v1472_v50 }
 0x20e   : > { %824 = vst [vmem:[%s1671_s25 + $0x18] sm:$0xff] %v812_v60  ;;  %826 = vst [vmem:[%s1671_s25 + $0x28] sm:$0xff] %v814_v14 }
 0x20f   : > { %825 = vst [vmem:[%s1671_s25 + $0x20] sm:$0xff] %v813_v63  ;;  %823 = vst [vmem:[%s1671_s25 + $0x10] sm:$0xff] %v811_v0  ;;  %v713_v49 = vpop.f32.mrb[12].mxu1 }
 0x210   : > { %v815_v1 = vmul.f32 %v713_v49, %v1587_v8  ;;  %v715_v19 = vpop.f32.mrb[13].mxu1 }
 0x211   : > { %v816_v2 = vmul.f32 %v715_v19, %v1573_v3 }
 0x212   : > { %827 = vst [vmem:[%s1671_s25 + $0x30] sm:$0xff] %v815_v1 }
 0x213   : > { %828 = vst [vmem:[%s1671_s25 + $0x38] sm:$0xff] %v816_v2  ;;  %v719_v18 = vpop.f32.mrb[14].mxu1  ;;  %v1126_v50 = vpop.f32.mrb[18].mxu0 }
 0x214   : > { %v818_v4 = vmul.f32 %v719_v18, %v1600_v16  ;;  %v721_v15 = vpop.f32.mrb[15].mxu1  ;;  %v800_v5 = vpop.f32.mrb[19].mxu0  ;;  %v820_v10 = vmul.f32 %v1126_v50, %v1580_v7 }
 0x215   : > { %v819_v6 = vmul.f32 %v721_v15, %v1592_v12  ;;  %v817_v9 = vmul.f32 %v800_v5, %v1568_v20 }
 0x216   : > { %830 = vst [vmem:[%s1671_s25 + $0x48] sm:$0xff] %v818_v4  ;;  %832 = vst [vmem:[%s1671_s25 + $0x58] sm:$0xff] %v820_v10 }
 0x217   : > { %831 = vst [vmem:[%s1671_s25 + $0x50] sm:$0xff] %v819_v6  ;;  %829 = vst [vmem:[%s1671_s25 + $0x40] sm:$0xff] %v817_v9 }
 0x218 PF: > { %s13_s12 = sadd.s32 1, %s1279_s12  }
 0x219   : > { %p10_p4 = scmp.ge.s32.totalorder %s13_s12, 4  }
 0x21b   :  { %12 = sbr.rel (!%p10_p4) target bundleno = 1 (0x1), region = 62 }

</bundles_post_ra>
